<compile_context>
chip_gen: v7x
topology: tpu7x:2x2x1
jax: 0.10.0
libtpu: 0.0.40
codegen_flags: <defaults>
</compile_context>

<pallas_src>
import functools

import jax
import jax.numpy as jnp
from jax import lax
from jax.experimental import pallas as pl
from jax.experimental.pallas import tpu as pltpu


# ---------------------------------------------------------------------------
# Generation-aware VMEM budgeting and tile selection
# ---------------------------------------------------------------------------
def _vmem_limit_bytes():
    cap = 64 * 1024 * 1024
    try:
        cap = int(pltpu.get_tpu_info().vmem_capacity_bytes)
    except Exception:
        pass
    if cap <= 64 * 1024 * 1024:          # v7x-class: stay well under 64 MiB physical
        return int(0.6 * cap)
    return min(100 * 1024 * 1024, int(0.78 * cap))   # v5e/v6e: use the 128 MiB headroom


def _pad_m(m):
    return ((m + 127) // 128) * 128


def _pick_tm(m_pad, k_rows, c_out, vmem_limit):
    """Largest lane tile dividing m_pad whose (double-buffered A + output + weights)
    footprint stays within ~70% of the per-generation VMEM budget."""
    for t in (512, 256, 128):
        if m_pad % t:
            continue
        a_bytes = 2 * k_rows * t * 2          # double-buffered bf16 A tile
        o_bytes = 2 * c_out * t * 4           # double-buffered output tile (f32 bound)
        w_bytes = c_out * k_rows * 2          # single-buffered bf16 weight block
        if a_bytes + o_bytes + w_bytes <= int(0.7 * vmem_limit):
            return t
    return 128


def _weight_spec(shape, index_map, single_buffer):
    if single_buffer:
        # Block index is constant across the grid: one buffer is enough; the second
        # pipeline copy would only waste VMEM at production channel counts.
        return pl.BlockSpec(shape, index_map, pipeline_mode=pl.Buffered(1))
    return pl.BlockSpec(shape, index_map)


# ---------------------------------------------------------------------------
# Pallas kernels
# ---------------------------------------------------------------------------
def _down_matmul_relu_kernel(w_ref, a_ref, o_ref):
    """o = relu(w @ a).  w:(inner,K) bf16, a:(K,tm) bf16, o:(inner,tm) bf16.
    The ReLU preceding the deconv is fused here (f32 on the VPU)."""
    o = jnp.dot(w_ref[...], a_ref[...], preferred_element_type=jnp.float32)
    o_ref[...] = jnp.maximum(o, 0.0).astype(o_ref.dtype)


def down_conv_relu(w_mat, patches_t, tm, vmem_limit, single_buffer):
    c_out, k = w_mat.shape
    _, m = patches_t.shape
    return pl.pallas_call(
        _down_matmul_relu_kernel,
        out_shape=jax.ShapeDtypeStruct((c_out, m), jnp.bfloat16),
        grid_spec=pltpu.PrefetchScalarGridSpec(
            num_scalar_prefetch=0,
            grid=(m // tm,),
            in_specs=[_weight_spec((c_out, k), lambda i: (0, 0), single_buffer),
                      pl.BlockSpec((k, tm), lambda i: (0, i))],
            out_specs=pl.BlockSpec((c_out, tm), lambda i: (0, i)),
        ),
        compiler_params=pltpu.CompilerParams(
            dimension_semantics=("parallel",),
            vmem_limit_bytes=vmem_limit),
    )(w_mat, patches_t)


def _up_matmul_stats_kernel(w_ref, a_ref, u_ref, sum_ref, ssq_ref):
    """Parity-folded deconv matmul with fused BatchNorm partial sums.

    w:(4*outer, 9*inner) bf16, a:(9*inner, tm) bf16, u:(4*outer, tm) bf16.
    sum/ssq:(4*outer, 1) f32 resident accumulators over the M ('arbitrary') axis;
    stats are taken from the f32 MXU result BEFORE the bf16 store.
    """
    o = jnp.dot(w_ref[...], a_ref[...], preferred_element_type=jnp.float32)
    u_ref[...] = o.astype(u_ref.dtype)

    @pl.when(pl.program_id(0) == 0)
    def _():
        sum_ref[...] = jnp.zeros_like(sum_ref)
        ssq_ref[...] = jnp.zeros_like(ssq_ref)

    sum_ref[...] += jnp.sum(o, axis=1, keepdims=True)
    ssq_ref[...] += jnp.sum(o * o, axis=1, keepdims=True)


def up_conv_with_bn_stats(w_cat, a9, tm, vmem_limit, single_buffer):
    rows, k = w_cat.shape
    _, m = a9.shape
    return pl.pallas_call(
        _up_matmul_stats_kernel,
        out_shape=(jax.ShapeDtypeStruct((rows, m), jnp.bfloat16),
                   jax.ShapeDtypeStruct((rows, 1), jnp.float32),
                   jax.ShapeDtypeStruct((rows, 1), jnp.float32)),
        grid_spec=pltpu.PrefetchScalarGridSpec(
            num_scalar_prefetch=0,
            grid=(m // tm,),
            in_specs=[_weight_spec((rows, k), lambda i: (0, 0), single_buffer),
                      pl.BlockSpec((k, tm), lambda i: (0, i))],
            out_specs=(pl.BlockSpec((rows, tm), lambda i: (0, i)),
                       pl.BlockSpec((rows, 1), lambda i: (0, 0)),
                       pl.BlockSpec((rows, 1), lambda i: (0, 0))),
        ),
        compiler_params=pltpu.CompilerParams(
            dimension_semantics=("arbitrary",),   # resident sum/ssq accumulators
            vmem_limit_bytes=vmem_limit),
    )(w_cat, a9)


# ---------------------------------------------------------------------------
# JAX glue: transposed (K, M) im2col, 9-tap views, folded deconv weights
# ---------------------------------------------------------------------------
def _down_patches_t(a_bf16, k, stride, pad):
    """im2col in transposed (K, M) layout; K order = (c, kh, kw), M order = (n, oh, ow)."""
    n, c, h, w = a_bf16.shape
    ap = jnp.pad(a_bf16, ((0, 0), (0, 0), (pad, pad), (pad, pad)))
    ho = (h + 2 * pad - k) // stride + 1
    wo = (w + 2 * pad - k) // stride + 1
    cols = []
    for kh in range(k):
        for kw in range(k):
            cols.append(ap[:, :, kh:kh + stride * ho:stride, kw:kw + stride * wo:stride])
    p = jnp.stack(cols, 0).reshape(k, k, n, c, ho, wo)
    p = p.transpose(3, 0, 1, 2, 4, 5)                      # (c, kh, kw, n, ho, wo)
    return p.reshape(c * k * k, n * ho * wo), ho, wo


def _up_tap_views(d, ho, wo):
    """9 shifted views of the 1-padded d, shared by all 4 output parities.
    Returns (inner*9, N*ho*wo) bf16; K order = (ci, a, b), a,b in {0,1,2}."""
    inner, n = d.shape[0], d.shape[1]
    dpad = jnp.pad(d, ((0, 0), (0, 0), (1, 1), (1, 1)))
    views = []
    for a in range(3):
        for b in range(3):
            views.append(dpad[:, :, a:a + ho, b:b + wo])
    v = jnp.stack(views, axis=1)                           # (inner, 9, n, ho, wo)
    return v.reshape(inner * 9, n * ho * wo)


def _up_folded_weights(w_up):
    """(inner, outer, 4, 4) ConvTranspose2d weight -> (4*outer, inner*9) matrix.

    Row block p = 2*dy+dx holds parity (dy,dx); column (ci, a, b) holds the conv-kernel
    tap kh=2a-dy, kw=2b-dx when (a-dy, b-dx) in {0,1}^2, zero otherwise.  Output pixel
    (2i+dy, 2j+dx) = sum_{ci,a,b} W_cat[(p,co),(ci,a,b)] * dpad[ci, i+a, j+b]."""
    wf = jnp.flip(w_up, axis=(2, 3)).transpose(1, 0, 2, 3)  # conv-equiv (outer, inner, 4, 4)
    outer, inner = wf.shape[0], wf.shape[1]
    zero = jnp.zeros((outer, inner), wf.dtype)
    row_blocks = []
    for dy in range(2):
        for dx in range(2):
            cols = []
            for a in range(3):
                for b in range(3):
                    r, s = a - dy, b - dx
                    if 0 <= r <= 1 and 0 <= s <= 1:
                        cols.append(wf[:, :, dy + 2 * r, dx + 2 * s])
                    else:
                        cols.append(zero)
            row_blocks.append(jnp.stack(cols, axis=2).reshape(outer, inner * 9))
    return jnp.concatenate(row_blocks, axis=0)             # (4*outer, inner*9)


# ---------------------------------------------------------------------------
# Module: parameters + forward
# ---------------------------------------------------------------------------
def init_params(key, in_ch, inner_ch, outer_ch):
    k1, k2, k3, k4 = jax.random.split(key, 4)
    # Conv2d weight: (out, in, kh, kw); ConvTranspose2d weight: (in, out, kh, kw).
    w_down = 0.1 * jax.random.normal(k1, (inner_ch, in_ch, 4, 4), jnp.float32)
    w_up = 0.1 * jax.random.normal(k2, (inner_ch, outer_ch, 4, 4), jnp.float32)
    gamma = 1.0 + 0.1 * jax.random.normal(k3, (outer_ch,), jnp.float32)
    beta = 0.1 * jax.random.normal(k4, (outer_ch,), jnp.float32)
    return dict(w_down=w_down, w_up=w_up, gamma=gamma, beta=beta)


def unet_innermost_block(x, params, *, single_buffer_weights=True, eps=1e-5):
    n, c_in, h, w = x.shape
    inner = params["w_down"].shape[0]
    outer = params["w_up"].shape[1]
    vmem_limit = _vmem_limit_bytes()

    # ---- down: LeakyReLU(0.2) -> Conv2d(k=4,s=2,p=1, bias=False); ReLU fused ----
    a = jnp.where(x >= 0, x, 0.2 * x).astype(jnp.bfloat16)
    patches_t, ho, wo = _down_patches_t(a, k=4, stride=2, pad=1)      # (c_in*16, M) bf16
    m = n * ho * wo
    m_pad = _pad_m(m)
    if m_pad != m:
        patches_t = jnp.pad(patches_t, ((0, 0), (0, m_pad - m)))
    k_down = c_in * 16
    tm_down = _pick_tm(m_pad, k_down, inner, vmem_limit)
    w_down_mat = params["w_down"].reshape(inner, k_down).astype(jnp.bfloat16)
    d_t = down_conv_relu(w_down_mat, patches_t, tm_down, vmem_limit,
                         single_buffer_weights)                       # (inner, Mpad) bf16

    # ---- up: ConvTranspose2d(k=4,s=2,p=1, bias=False), parities folded into rows ----
    d = d_t[:, :m].reshape(inner, n, ho, wo)
    a9 = _up_tap_views(d, ho, wo)                                     # (9*inner, M) bf16
    if m_pad != m:
        a9 = jnp.pad(a9, ((0, 0), (0, m_pad - m)))                    # zero cols: no-op for stats
    w_cat = _up_folded_weights(params["w_up"]).astype(jnp.bfloat16)   # (4*outer, 9*inner)
    rows = 4 * outer
    k_up = 9 * inner
    tm_up = _pick_tm(m_pad, k_up, rows, vmem_limit)
    u_stk, sums, ssqs = up_conv_with_bn_stats(w_cat, a9, tm_up, vmem_limit,
                                              single_buffer_weights)

    # ---- BatchNorm2d finalize: tiny per-channel reduction in plain JAX ----
    count = 4.0 * m                                                   # = N*H*W per channel
    sums_pc = sums.reshape(4, outer).sum(axis=0)
    ssqs_pc = ssqs.reshape(4, outer).sum(axis=0)
    mean = sums_pc / count
    var = jnp.maximum(ssqs_pc / count - mean * mean, 0.0)             # biased var (PyTorch BN)
    inv = lax.rsqrt(var + eps)
    scale = params["gamma"].astype(jnp.float32) * inv
    shift = params["beta"].astype(jnp.float32) - mean * scale

    # ---- normalize + parity interleave + skip concat in one fused XLA pass ----
    u6 = u_stk[:, :m].reshape(2, 2, outer, n, ho, wo).astype(jnp.float32)  # (dy,dx,co,n,i,j)
    u6 = u6 * scale.reshape(1, 1, outer, 1, 1, 1) + shift.reshape(1, 1, outer, 1, 1, 1)
    u_nchw = u6.transpose(3, 2, 4, 0, 5, 1).reshape(n, outer, 2 * ho, 2 * wo)
    return jnp.concatenate([x, u_nchw], axis=1)


# ---------------------------------------------------------------------------
# Pure-JAX reference (same math, XLA convs, full f32) for validation
# ---------------------------------------------------------------------------
def reference(x, params, eps=1e-5):
    a = jnp.where(x >= 0, x, 0.2 * x)
    d = lax.conv_general_dilated(a, params["w_down"], (2, 2), [(1, 1), (1, 1)],
                                 dimension_numbers=("NCHW", "OIHW", "NCHW"))
    r = jnp.maximum(d, 0.0)
    w_conv = jnp.flip(params["w_up"], axis=(2, 3)).transpose(1, 0, 2, 3)
    u = lax.conv_general_dilated(r, w_conv, (1, 1), [(2, 2), (2, 2)],
                                 lhs_dilation=(2, 2),
                                 dimension_numbers=("NCHW", "OIHW", "NCHW"))
    mean = u.mean(axis=(0, 2, 3), keepdims=True)
    var = ((u - mean) ** 2).mean(axis=(0, 2, 3), keepdims=True)
    un = ((u - mean) * lax.rsqrt(var + eps)
          * params["gamma"].reshape(1, -1, 1, 1) + params["beta"].reshape(1, -1, 1, 1))
    return jnp.concatenate([x, un], axis=1)


if __name__ == "__main__":
    key = jax.random.PRNGKey(0)
    kx, kp = jax.random.split(key)

    N, outer_ch, inner_ch, H, W = 2, 4, 8, 16, 16
    in_ch = outer_ch  # in_channels=None -> outer_channels

    x = jax.random.normal(kx, (N, in_ch, H, W), jnp.float32)
    params = init_params(kp, in_ch, inner_ch, outer_ch)
    ref = reference(x, params)

    def run(single_buffer):
        fwd = jax.jit(functools.partial(unet_innermost_block,
                                        single_buffer_weights=single_buffer))
        return jax.block_until_ready(fwd(x, params))

    try:
        out = run(True)
    except Exception:
        # Fallback if this jax build rejects pipeline_mode=pl.Buffered(1) on BlockSpec.
        out = run(False)

    assert out.shape == (N, in_ch + outer_ch, H, W), out.shape
    max_err = float(jnp.max(jnp.abs(out - ref)))
    # bf16 MXU operands -> ~1-2% relative error on the post-BN (unit-variance) values.
    assert jnp.allclose(out, ref, atol=5e-2, rtol=5e-2), max_err

    print("KERNEL_OK")
</pallas_src>

<mosaic_0001>
module attributes {stable_mosaic.version = 11 : i64} {
  func.func @_down_matmul_relu_kernel(%arg0: i32, %arg1: memref<8x64xbf16, #tpu.memory_space<vmem>>, %arg2: memref<64x128xbf16, #tpu.memory_space<vmem>>, %arg3: memref<8x128xbf16, #tpu.memory_space<vmem>>) attributes {dimension_semantics = [#tpu.dimension_semantics<parallel>], iteration_bounds = array<i64: 1>, scalar_prefetch = 0 : i64, scratch_operands = 0 : i64, tpu.core_type = #tpu.core_type<tc>, window_params = [{pipeline_mode = #tpu.pipeline_mode<synchronous>, transform_indices = @transform_0, window_bounds = array<i64: 8, 64>}, {transform_indices = @transform_1, window_bounds = array<i64: 64, 128>}, {transform_indices = @transform_2, window_bounds = array<i64: 8, 128>}]} {
    %c0 = arith.constant 0 : index
    %c0_0 = arith.constant 0 : index
    %0 = vector.load %arg1[%c0, %c0_0] : memref<8x64xbf16, #tpu.memory_space<vmem>>, vector<8x64xbf16>
    %c0_1 = arith.constant 0 : index
    %c0_2 = arith.constant 0 : index
    %1 = vector.load %arg2[%c0_1, %c0_2] : memref<64x128xbf16, #tpu.memory_space<vmem>>, vector<64x128xbf16>
    %cst = arith.constant dense<0.000000e+00> : vector<8x128xf32>
    %2 = tpu.matmul %0, %1, %cst {dimension_numbers = #tpu.dot_dimension_numbers<[1], [0], [0], [1], [0, 0, 1, 1], [], []>} : vector<8x64xbf16>, vector<64x128xbf16>, vector<8x128xf32> -> vector<8x128xf32>
    %cst_3 = arith.constant 0.000000e+00 : f32
    %3 = vector.broadcast %cst_3 : f32 to vector<8x128xf32>
    %4 = arith.maximumf %2, %3 : vector<8x128xf32>
    %5 = arith.truncf %4 : vector<8x128xf32> to vector<8x128xbf16>
    %c0_4 = arith.constant 0 : index
    %c0_5 = arith.constant 0 : index
    %6 = vector.load %arg3[%c0_4, %c0_5] : memref<8x128xbf16, #tpu.memory_space<vmem>>, vector<8x128xbf16>
    tpu.vector_store %arg3[%c0_4, %c0_5], %5 {strides = array<i32>} : memref<8x128xbf16, #tpu.memory_space<vmem>>, vector<8x128xbf16>,
    return
  }
  func.func @transform_0(%arg0: i32) -> (i32, i32) {
    %c0_i32 = arith.constant 0 : i32
    %c0_i32_0 = arith.constant 0 : i32
    %c0_i32_1 = arith.constant 0 : i32
    return %c0_i32, %c0_i32_0 : i32, i32
  }
  func.func @transform_1(%arg0: i32) -> (i32, i32) {
    %c0_i32 = arith.constant 0 : i32
    %c0_i32_0 = arith.constant 0 : i32
    return %c0_i32, %arg0 : i32, i32
  }
  func.func @transform_2(%arg0: i32) -> (i32, i32) {
    %c0_i32 = arith.constant 0 : i32
    %c0_i32_0 = arith.constant 0 : i32
    return %c0_i32, %arg0 : i32, i32
  }
}

module attributes {stable_mosaic.version = 11 : i64} {
  func.func @_up_matmul_stats_kernel(%arg0: i32, %arg1: memref<16x72xbf16, #tpu.memory_space<vmem>>, %arg2: memref<72x128xbf16, #tpu.memory_space<vmem>>, %arg3: memref<16x128xbf16, #tpu.memory_space<vmem>>, %arg4: memref<16x1xf32, #tpu.memory_space<vmem>>, %arg5: memref<16x1xf32, #tpu.memory_space<vmem>>) attributes {dimension_semantics = [#tpu.dimension_semantics<arbitrary>], iteration_bounds = array<i64: 1>, scalar_prefetch = 0 : i64, scratch_operands = 0 : i64, tpu.core_type = #tpu.core_type<tc>, window_params = [{pipeline_mode = #tpu.pipeline_mode<synchronous>, transform_indices = @transform_0, window_bounds = array<i64: 16, 72>}, {transform_indices = @transform_1, window_bounds = array<i64: 72, 128>}, {transform_indices = @transform_2, window_bounds = array<i64: 16, 128>}, {pipeline_mode = #tpu.pipeline_mode<synchronous>, transform_indices = @transform_3, window_bounds = array<i64: 16, 1>}, {pipeline_mode = #tpu.pipeline_mode<synchronous>, transform_indices = @transform_4, window_bounds = array<i64: 16, 1>}]} {
    %c0 = arith.constant 0 : index
    %c0_0 = arith.constant 0 : index
    %0 = vector.load %arg1[%c0, %c0_0] : memref<16x72xbf16, #tpu.memory_space<vmem>>, vector<16x72xbf16>
    %c0_1 = arith.constant 0 : index
    %c0_2 = arith.constant 0 : index
    %1 = vector.load %arg2[%c0_1, %c0_2] : memref<72x128xbf16, #tpu.memory_space<vmem>>, vector<72x128xbf16>
    %cst = arith.constant dense<0.000000e+00> : vector<16x128xf32>
    %2 = tpu.matmul %0, %1, %cst {dimension_numbers = #tpu.dot_dimension_numbers<[1], [0], [0], [1], [0, 0, 1, 1], [], []>} : vector<16x72xbf16>, vector<72x128xbf16>, vector<16x128xf32> -> vector<16x128xf32>
    %3 = arith.truncf %2 : vector<16x128xf32> to vector<16x128xbf16>
    %c0_3 = arith.constant 0 : index
    %c0_4 = arith.constant 0 : index
    %4 = vector.load %arg3[%c0_3, %c0_4] : memref<16x128xbf16, #tpu.memory_space<vmem>>, vector<16x128xbf16>
    tpu.vector_store %arg3[%c0_3, %c0_4], %3 {strides = array<i32>} : memref<16x128xbf16, #tpu.memory_space<vmem>>, vector<16x128xbf16>,
    %c0_i32 = arith.constant 0 : i32
    %5 = arith.cmpi eq, %arg0, %c0_i32 : i32
    %6 = arith.extui %5 : i1 to i32
    %c0_i32_5 = arith.constant 0 : i32
    %7 = arith.cmpi ne, %6, %c0_i32_5 : i32
    scf.if %7 {
      %cst_16 = arith.constant 0.000000e+00 : f32
      %19 = vector.broadcast %cst_16 : f32 to vector<16x1xf32>
      %c0_17 = arith.constant 0 : index
      %c0_18 = arith.constant 0 : index
      %20 = vector.load %arg4[%c0_17, %c0_18] : memref<16x1xf32, #tpu.memory_space<vmem>>, vector<16x1xf32>
      tpu.vector_store %arg4[%c0_17, %c0_18], %19 {strides = array<i32>} : memref<16x1xf32, #tpu.memory_space<vmem>>, vector<16x1xf32>,
      %cst_19 = arith.constant 0.000000e+00 : f32
      %21 = vector.broadcast %cst_19 : f32 to vector<16x1xf32>
      %c0_20 = arith.constant 0 : index
      %c0_21 = arith.constant 0 : index
      %22 = vector.load %arg5[%c0_20, %c0_21] : memref<16x1xf32, #tpu.memory_space<vmem>>, vector<16x1xf32>
      tpu.vector_store %arg5[%c0_20, %c0_21], %21 {strides = array<i32>} : memref<16x1xf32, #tpu.memory_space<vmem>>, vector<16x1xf32>,
    } else {
    }
    %c0_6 = arith.constant 0 : index
    %c0_7 = arith.constant 0 : index
    %8 = vector.load %arg4[%c0_6, %c0_7] : memref<16x1xf32, #tpu.memory_space<vmem>>, vector<16x1xf32>
    %cst_8 = arith.constant dense<0.000000e+00> : vector<16xf32>
    %9 = vector.multi_reduction <add>, %2, %cst_8 [1] : vector<16x128xf32> to vector<16xf32>
    %10 = vector.shape_cast %9 : vector<16xf32> to vector<16x1xf32>
    %11 = arith.addf %8, %10 : vector<16x1xf32>
    %c0_9 = arith.constant 0 : index
    %c0_10 = arith.constant 0 : index
    %12 = vector.load %arg4[%c0_9, %c0_10] : memref<16x1xf32, #tpu.memory_space<vmem>>, vector<16x1xf32>
    tpu.vector_store %arg4[%c0_9, %c0_10], %11 {strides = array<i32>} : memref<16x1xf32, #tpu.memory_space<vmem>>, vector<16x1xf32>,
    %c0_11 = arith.constant 0 : index
    %c0_12 = arith.constant 0 : index
    %13 = vector.load %arg5[%c0_11, %c0_12] : memref<16x1xf32, #tpu.memory_space<vmem>>, vector<16x1xf32>
    %14 = arith.mulf %2, %2 : vector<16x128xf32>
    %cst_13 = arith.constant dense<0.000000e+00> : vector<16xf32>
    %15 = vector.multi_reduction <add>, %14, %cst_13 [1] : vector<16x128xf32> to vector<16xf32>
    %16 = vector.shape_cast %15 : vector<16xf32> to vector<16x1xf32>
    %17 = arith.addf %13, %16 : vector<16x1xf32>
    %c0_14 = arith.constant 0 : index
    %c0_15 = arith.constant 0 : index
    %18 = vector.load %arg5[%c0_14, %c0_15] : memref<16x1xf32, #tpu.memory_space<vmem>>, vector<16x1xf32>
    tpu.vector_store %arg5[%c0_14, %c0_15], %17 {strides = array<i32>} : memref<16x1xf32, #tpu.memory_space<vmem>>, vector<16x1xf32>,
    return
  }
  func.func @transform_0(%arg0: i32) -> (i32, i32) {
    %c0_i32 = arith.constant 0 : i32
    %c0_i32_0 = arith.constant 0 : i32
    %c0_i32_1 = arith.constant 0 : i32
    return %c0_i32, %c0_i32_0 : i32, i32
  }
  func.func @transform_1(%arg0: i32) -> (i32, i32) {
    %c0_i32 = arith.constant 0 : i32
    %c0_i32_0 = arith.constant 0 : i32
    return %c0_i32, %arg0 : i32, i32
  }
  func.func @transform_2(%arg0: i32) -> (i32, i32) {
    %c0_i32 = arith.constant 0 : i32
    %c0_i32_0 = arith.constant 0 : i32
    return %c0_i32, %arg0 : i32, i32
  }
  func.func @transform_3(%arg0: i32) -> (i32, i32) {
    %c0_i32 = arith.constant 0 : i32
    %c0_i32_0 = arith.constant 0 : i32
    %c0_i32_1 = arith.constant 0 : i32
    return %c0_i32, %c0_i32_0 : i32, i32
  }
  func.func @transform_4(%arg0: i32) -> (i32, i32) {
    %c0_i32 = arith.constant 0 : i32
    %c0_i32_0 = arith.constant 0 : i32
    %c0_i32_1 = arith.constant 0 : i32
    return %c0_i32, %c0_i32_0 : i32, i32
  }
}

module attributes {stable_mosaic.version = 11 : i64} {
  func.func @_down_matmul_relu_kernel(%arg0: i32, %arg1: memref<8x64xbf16, #tpu.memory_space<vmem>>, %arg2: memref<64x128xbf16, #tpu.memory_space<vmem>>, %arg3: memref<8x128xbf16, #tpu.memory_space<vmem>>) attributes {dimension_semantics = [#tpu.dimension_semantics<parallel>], iteration_bounds = array<i64: 1>, scalar_prefetch = 0 : i64, scratch_operands = 0 : i64, tpu.core_type = #tpu.core_type<tc>, window_params = [{pipeline_mode = #tpu.pipeline_mode<synchronous>, transform_indices = @transform_0, window_bounds = array<i64: 8, 64>}, {transform_indices = @transform_1, window_bounds = array<i64: 64, 128>}, {transform_indices = @transform_2, window_bounds = array<i64: 8, 128>}]} {
    %c0 = arith.constant 0 : index
    %c0_0 = arith.constant 0 : index
    %0 = vector.load %arg1[%c0, %c0_0] : memref<8x64xbf16, #tpu.memory_space<vmem>>, vector<8x64xbf16>
    %c0_1 = arith.constant 0 : index
    %c0_2 = arith.constant 0 : index
    %1 = vector.load %arg2[%c0_1, %c0_2] : memref<64x128xbf16, #tpu.memory_space<vmem>>, vector<64x128xbf16>
    %cst = arith.constant dense<0.000000e+00> : vector<8x128xf32>
    %2 = tpu.matmul %0, %1, %cst {dimension_numbers = #tpu.dot_dimension_numbers<[1], [0], [0], [1], [0, 0, 1, 1], [], []>} : vector<8x64xbf16>, vector<64x128xbf16>, vector<8x128xf32> -> vector<8x128xf32>
    %cst_3 = arith.constant 0.000000e+00 : f32
    %3 = vector.broadcast %cst_3 : f32 to vector<8x128xf32>
    %4 = arith.maximumf %2, %3 : vector<8x128xf32>
    %5 = arith.truncf %4 : vector<8x128xf32> to vector<8x128xbf16>
    %c0_4 = arith.constant 0 : index
    %c0_5 = arith.constant 0 : index
    %6 = vector.load %arg3[%c0_4, %c0_5] : memref<8x128xbf16, #tpu.memory_space<vmem>>, vector<8x128xbf16>
    tpu.vector_store %arg3[%c0_4, %c0_5], %5 {strides = array<i32>} : memref<8x128xbf16, #tpu.memory_space<vmem>>, vector<8x128xbf16>,
    return
  }
  func.func @transform_0(%arg0: i32) -> (i32, i32) {
    %c0_i32 = arith.constant 0 : i32
    %c0_i32_0 = arith.constant 0 : i32
    %c0_i32_1 = arith.constant 0 : i32
    return %c0_i32, %c0_i32_0 : i32, i32
  }
  func.func @transform_1(%arg0: i32) -> (i32, i32) {
    %c0_i32 = arith.constant 0 : i32
    %c0_i32_0 = arith.constant 0 : i32
    return %c0_i32, %arg0 : i32, i32
  }
  func.func @transform_2(%arg0: i32) -> (i32, i32) {
    %c0_i32 = arith.constant 0 : i32
    %c0_i32_0 = arith.constant 0 : i32
    return %c0_i32, %arg0 : i32, i32
  }
}

module attributes {stable_mosaic.version = 11 : i64} {
  func.func @_up_matmul_stats_kernel(%arg0: i32, %arg1: memref<16x72xbf16, #tpu.memory_space<vmem>>, %arg2: memref<72x128xbf16, #tpu.memory_space<vmem>>, %arg3: memref<16x128xbf16, #tpu.memory_space<vmem>>, %arg4: memref<16x1xf32, #tpu.memory_space<vmem>>, %arg5: memref<16x1xf32, #tpu.memory_space<vmem>>) attributes {dimension_semantics = [#tpu.dimension_semantics<arbitrary>], iteration_bounds = array<i64: 1>, scalar_prefetch = 0 : i64, scratch_operands = 0 : i64, tpu.core_type = #tpu.core_type<tc>, window_params = [{pipeline_mode = #tpu.pipeline_mode<synchronous>, transform_indices = @transform_0, window_bounds = array<i64: 16, 72>}, {transform_indices = @transform_1, window_bounds = array<i64: 72, 128>}, {transform_indices = @transform_2, window_bounds = array<i64: 16, 128>}, {pipeline_mode = #tpu.pipeline_mode<synchronous>, transform_indices = @transform_3, window_bounds = array<i64: 16, 1>}, {pipeline_mode = #tpu.pipeline_mode<synchronous>, transform_indices = @transform_4, window_bounds = array<i64: 16, 1>}]} {
    %c0 = arith.constant 0 : index
    %c0_0 = arith.constant 0 : index
    %0 = vector.load %arg1[%c0, %c0_0] : memref<16x72xbf16, #tpu.memory_space<vmem>>, vector<16x72xbf16>
    %c0_1 = arith.constant 0 : index
    %c0_2 = arith.constant 0 : index
    %1 = vector.load %arg2[%c0_1, %c0_2] : memref<72x128xbf16, #tpu.memory_space<vmem>>, vector<72x128xbf16>
    %cst = arith.constant dense<0.000000e+00> : vector<16x128xf32>
    %2 = tpu.matmul %0, %1, %cst {dimension_numbers = #tpu.dot_dimension_numbers<[1], [0], [0], [1], [0, 0, 1, 1], [], []>} : vector<16x72xbf16>, vector<72x128xbf16>, vector<16x128xf32> -> vector<16x128xf32>
    %3 = arith.truncf %2 : vector<16x128xf32> to vector<16x128xbf16>
    %c0_3 = arith.constant 0 : index
    %c0_4 = arith.constant 0 : index
    %4 = vector.load %arg3[%c0_3, %c0_4] : memref<16x128xbf16, #tpu.memory_space<vmem>>, vector<16x128xbf16>
    tpu.vector_store %arg3[%c0_3, %c0_4], %3 {strides = array<i32>} : memref<16x128xbf16, #tpu.memory_space<vmem>>, vector<16x128xbf16>,
    %c0_i32 = arith.constant 0 : i32
    %5 = arith.cmpi eq, %arg0, %c0_i32 : i32
    %6 = arith.extui %5 : i1 to i32
    %c0_i32_5 = arith.constant 0 : i32
    %7 = arith.cmpi ne, %6, %c0_i32_5 : i32
    scf.if %7 {
      %cst_16 = arith.constant 0.000000e+00 : f32
      %19 = vector.broadcast %cst_16 : f32 to vector<16x1xf32>
      %c0_17 = arith.constant 0 : index
      %c0_18 = arith.constant 0 : index
      %20 = vector.load %arg4[%c0_17, %c0_18] : memref<16x1xf32, #tpu.memory_space<vmem>>, vector<16x1xf32>
      tpu.vector_store %arg4[%c0_17, %c0_18], %19 {strides = array<i32>} : memref<16x1xf32, #tpu.memory_space<vmem>>, vector<16x1xf32>,
      %cst_19 = arith.constant 0.000000e+00 : f32
      %21 = vector.broadcast %cst_19 : f32 to vector<16x1xf32>
      %c0_20 = arith.constant 0 : index
      %c0_21 = arith.constant 0 : index
      %22 = vector.load %arg5[%c0_20, %c0_21] : memref<16x1xf32, #tpu.memory_space<vmem>>, vector<16x1xf32>
      tpu.vector_store %arg5[%c0_20, %c0_21], %21 {strides = array<i32>} : memref<16x1xf32, #tpu.memory_space<vmem>>, vector<16x1xf32>,
    } else {
    }
    %c0_6 = arith.constant 0 : index
    %c0_7 = arith.constant 0 : index
    %8 = vector.load %arg4[%c0_6, %c0_7] : memref<16x1xf32, #tpu.memory_space<vmem>>, vector<16x1xf32>
    %cst_8 = arith.constant dense<0.000000e+00> : vector<16xf32>
    %9 = vector.multi_reduction <add>, %2, %cst_8 [1] : vector<16x128xf32> to vector<16xf32>
    %10 = vector.shape_cast %9 : vector<16xf32> to vector<16x1xf32>
    %11 = arith.addf %8, %10 : vector<16x1xf32>
    %c0_9 = arith.constant 0 : index
    %c0_10 = arith.constant 0 : index
    %12 = vector.load %arg4[%c0_9, %c0_10] : memref<16x1xf32, #tpu.memory_space<vmem>>, vector<16x1xf32>
    tpu.vector_store %arg4[%c0_9, %c0_10], %11 {strides = array<i32>} : memref<16x1xf32, #tpu.memory_space<vmem>>, vector<16x1xf32>,
    %c0_11 = arith.constant 0 : index
    %c0_12 = arith.constant 0 : index
    %13 = vector.load %arg5[%c0_11, %c0_12] : memref<16x1xf32, #tpu.memory_space<vmem>>, vector<16x1xf32>
    %14 = arith.mulf %2, %2 : vector<16x128xf32>
    %cst_13 = arith.constant dense<0.000000e+00> : vector<16xf32>
    %15 = vector.multi_reduction <add>, %14, %cst_13 [1] : vector<16x128xf32> to vector<16xf32>
    %16 = vector.shape_cast %15 : vector<16xf32> to vector<16x1xf32>
    %17 = arith.addf %13, %16 : vector<16x1xf32>
    %c0_14 = arith.constant 0 : index
    %c0_15 = arith.constant 0 : index
    %18 = vector.load %arg5[%c0_14, %c0_15] : memref<16x1xf32, #tpu.memory_space<vmem>>, vector<16x1xf32>
    tpu.vector_store %arg5[%c0_14, %c0_15], %17 {strides = array<i32>} : memref<16x1xf32, #tpu.memory_space<vmem>>, vector<16x1xf32>,
    return
  }
  func.func @transform_0(%arg0: i32) -> (i32, i32) {
    %c0_i32 = arith.constant 0 : i32
    %c0_i32_0 = arith.constant 0 : i32
    %c0_i32_1 = arith.constant 0 : i32
    return %c0_i32, %c0_i32_0 : i32, i32
  }
  func.func @transform_1(%arg0: i32) -> (i32, i32) {
    %c0_i32 = arith.constant 0 : i32
    %c0_i32_0 = arith.constant 0 : i32
    return %c0_i32, %arg0 : i32, i32
  }
  func.func @transform_2(%arg0: i32) -> (i32, i32) {
    %c0_i32 = arith.constant 0 : i32
    %c0_i32_0 = arith.constant 0 : i32
    return %c0_i32, %arg0 : i32, i32
  }
  func.func @transform_3(%arg0: i32) -> (i32, i32) {
    %c0_i32 = arith.constant 0 : i32
    %c0_i32_0 = arith.constant 0 : i32
    %c0_i32_1 = arith.constant 0 : i32
    return %c0_i32, %c0_i32_0 : i32, i32
  }
  func.func @transform_4(%arg0: i32) -> (i32, i32) {
    %c0_i32 = arith.constant 0 : i32
    %c0_i32_0 = arith.constant 0 : i32
    %c0_i32_1 = arith.constant 0 : i32
    return %c0_i32, %c0_i32_0 : i32, i32
  }
}

</mosaic_0001>

<bundles_post_ra>
// kernel: unet_innermost_block.2
= control target key start
LH: loop header
LB: loop body
LE: loop exit
PB: predicated region body
PF: predicated region fallthrough
CT: control target
= control target key end

     0   :  { %v124_v0 = vmov 0.0   ;;  %vm125_vm0 = vmmov 0   ;;  %vm45_vm1 = vcmask 523264   ;;  %s159_s1 = inlined_call_operand.vmem [shape: bf16[64,128], index: 1, kind: input, shape index: {}]   ;;  %s160_s0 = inlined_call_operand.vmem [shape: bf16[8,64], index: 0, kind: input, shape index: {}]   ;;  %s161_s2 = inlined_call_operand.vmem [shape: bf16[8,128], index: 2, kind: output, shape index: {}]  }
   0x1   :  { %106 = vmatprep.subr.bf16.mxu0 %v124_v0  ;;  %v120_v1 = vld [vmem:[%s159_s1] sm:$0xff]   ;;  %114 = vmatprep.mubr.msk.bf16.mxu0 %vm125_vm0, %v124_v0  ;;  %v121_v2 = vld [vmem:[%s159_s1 + $0x8] sm:$0xff]   ;;  %v122_v3 = vld [vmem:[%s159_s1 + $0x10] sm:$0xff]  }
   0x2   :  { %107 = vmatpush3.bf16.msra.mxu0 %v120_v1  ;;  %v123_v4 = vld [vmem:[%s159_s1 + $0x18] sm:$0xff]   ;;  %v12_v5 = vld [vmem:[%s160_s0] sm:$0xf] }
   0x3   :  { %108 = vmatprep.subr.bf16.mxu0 %v124_v0 }
   0x6   :  { %109 = vmatpush3.bf16.msra.mxu0 %v121_v2 }
   0x7   :  { %110 = vmatprep.subr.bf16.mxu0 %v124_v0 }
   0xa   :  { %111 = vmatpush3.bf16.msra.mxu0 %v122_v3 }
   0xb   :  { %112 = vmatprep.subr.bf16.mxu0 %v124_v0 }
   0xe   :  { %113 = vmatpush3.bf16.msra.mxu0 %v123_v4 }
  0x11   :  { %115 = vmatmul.mubr.msk.bf16.vlgmr.msra.gmra.mrb[0].mxu0 %vm45_vm1, %v12_v5 }
  0xe4   :  { %v83_v6 = vpop.f32.mrb[0].mxu0 }
  0xe5   :  { %v89_v7 = vmax.f32 %v83_v6, 0.0  ;;  %v116_v8 = vpop.f32.mrb[1].mxu0 }
  0xe6   :  { %v86_v9 = vpop.f32.mrb[2].mxu0 }
  0xe7   :  { %v90_v10 = vpack.c.bf16 %v89_v7, %v89_v7  ;;  %v117_v11 = vpop.f32.mrb[3].mxu0 }
  0xe9   :  { %91 = vst [vmem:[%s161_s2] sm:$0xf] %v90_v10 }

// kernel: squeeze.32
= control target key start
LH: loop header
LB: loop body
LE: loop exit
PB: predicated region body
PF: predicated region fallthrough
CT: control target
= control target key end

     0   :  { %v55_v8 = vmov 0.0   ;;  %s84_s0 = inlined_call_operand.vmem [shape: bf16[4,8], index: 0, kind: input, shape index: {}]   ;;  %s85_s1 = inlined_call_operand.vmem [shape: bf16[4,8,1], index: 1, kind: output, shape index: {}]  }
   0x1   :  { %v50_v0 = vld [vmem:[%s84_s0 + $0x1] ss:$0 sm:$0xff]  ;;  %v4_v1 = vld [vmem:[%s84_s0] ss:$0 sm:$0xff] }
   0x2   :  { %v27_v2 = vunpack.i.l.bf16 %v50_v0  ;;  %v5_v3 = vunpack.i.l.bf16 %v4_v1  ;;  %v41_v4 = vunpack.i.h.bf16 %v50_v0  ;;  %v17_v5 = vunpack.i.h.bf16 %v4_v1 }
   0x4   :  { %32 = vbcast.lane.b32.xlu1 %v27_v2, 256  ;;  %10 = vbcast.lane.b32.xlu0 %v5_v3, 256 }
   0x8   :  { %44 = vbcast.lane.b32.xlu1 %v41_v4, 256  ;;  %20 = vbcast.lane.b32.xlu0 %v17_v5, 256 }
  0x76   :  { %v33_v6 = vpop.permute.xlu1 %32  ;;  %v11_v7 = vpop.permute.xlu0 %10 }
  0x77   :  { %v35_v9 = vpack.c.bf16 %v55_v8, %v33_v6  ;;  %v12_v10 = vpack.c.bf16 %v55_v8, %v11_v7 }
  0x79   :  { %51 = vst [vmem:[%s85_s1 + $0x8] sm:$0xf] %v35_v9  ;;  %13 = vst [vmem:[%s85_s1] sm:$0xf] %v12_v10 }
  0x7a   :  { %v45_v11 = vpop.permute.xlu1 %44  ;;  %v21_v12 = vpop.permute.xlu0 %20 }
  0x7b   :  { %v47_v13 = vpack.c.bf16 %v55_v8, %v45_v11  ;;  %v23_v14 = vpack.c.bf16 %v55_v8, %v21_v12 }
  0x7d   :  { %53 = vst [vmem:[%s85_s1 + $0xc] sm:$0xf] %v47_v13  ;;  %49 = vst [vmem:[%s85_s1 + $0x4] sm:$0xf] %v23_v14 }

// kernel: unet_innermost_block.3
= control target key start
LH: loop header
LB: loop body
LE: loop exit
PB: predicated region body
PF: predicated region fallthrough
CT: control target
= control target key end

     0   :  { %v205_v0 = vmov 0.0   ;;  %vm206_vm0 = vmmov 0   ;;  %vm62_vm1 = vcmask 1043456   ;;  %vm58_vm2 = vcmask 588800   ;;  %s297_s1 = inlined_call_operand.vmem [shape: bf16[72,128], index: 1, kind: input, shape index: {}]   ;;  %s298_s0 = inlined_call_operand.vmem [shape: bf16[16,72], index: 0, kind: input, shape index: {}]   ;;  %s299_s3 = inlined_call_operand.vmem [shape: f32[16,1], index: 3, kind: output, shape index: {1}]   ;;  %s300_s2 = inlined_call_operand.vmem [shape: bf16[16,128], index: 2, kind: output, shape index: {0}]   ;;  %s301_s4 = inlined_call_operand.vmem [shape: f32[16,1], index: 4, kind: output, shape index: {2}]  }
   0x1   :  { %183 = vmatprep.subr.bf16.mxu0 %v205_v0  ;;  %v199_v1 = vld [vmem:[%s297_s1] sm:$0xff]   ;;  %193 = vmatprep.mubr.msk.bf16.mxu0 %vm206_vm0, %v205_v0  ;;  %v200_v2 = vld [vmem:[%s297_s1 + $0x8] sm:$0xff]   ;;  %v201_v3 = vld [vmem:[%s297_s1 + $0x10] sm:$0xff]   ;;  %vm121_vm3 = vcmask 7168  }
   0x2   :  { %184 = vmatpush3.bf16.msra.mxu0 %v199_v1  ;;  %v202_v4 = vld [vmem:[%s297_s1 + $0x18] sm:$0xff]   ;;  %v203_v5 = vld [vmem:[%s297_s1 + $0x20] ss:$0 sps:$4 sm:$0xff]   ;;  %122 = vst.msk [vmem:[%s299_s3] sm:$0xff] %vm121_vm3, %v205_v0  ;;  %123 = vst.msk [vmem:[%s299_s3 + $0x8] sm:$0xff] %vm121_vm3, %v205_v0 }
   0x3   :  { %185 = vmatprep.subr.bf16.mxu0 %v205_v0  ;;  %v64_v6 = vsel %vm62_vm1, %v203_v5, 0  ;;  %v204_v7 = vld [vmem:[%s298_s0] sm:$0xff]   ;;  %124 = vst.msk [vmem:[%s301_s4] sm:$0xff] %vm121_vm3, %v205_v0  ;;  %125 = vst.msk [vmem:[%s301_s4 + $0x8] sm:$0xff] %vm121_vm3, %v205_v0 }
   0x6   :  { %186 = vmatpush3.bf16.msra.mxu0 %v200_v2 }
   0x7   :  { %187 = vmatprep.subr.bf16.mxu0 %v205_v0 }
   0x9   :  { %v126_v15 = vld [vmem:[%s299_s3] sm:$0xff]  ;;  %v127_v20 = vld [vmem:[%s299_s3 + $0x8] sm:$0xff] }
   0xa   :  { %188 = vmatpush3.bf16.msra.mxu0 %v201_v3  ;;  %v137_v17 = vld [vmem:[%s301_s4] sm:$0xff]  ;;  %v138_v23 = vld [vmem:[%s301_s4 + $0x8] sm:$0xff] }
   0xb   :  { %189 = vmatprep.subr.bf16.mxu0 %v205_v0 }
   0xe   :  { %190 = vmatpush3.bf16.msra.mxu0 %v202_v4 }
   0xf   :  { %191 = vmatprep.subr.bf16.mxu0 %v205_v0 }
  0x12   :  { %192 = vmatpush3.bf16.msra.mxu0 %v64_v6 }
  0x15   :  { %194 = vmatmul.mubr.msk.bf16.vlgmr.msra.gmra.mrb[0].mxu0 %vm58_vm2, %v204_v7 }
  0xe8   :  { %v100_v8 = vpop.f32.mrb[0].mxu0 }
  0xe9   :  { %128 = vadd.xlane.f32.xlu0 %v100_v8  ;;  %v195_v9 = vpop.f32.mrb[1].mxu0  ;;  %v139_v10 = vmul.f32 %v100_v8, %v100_v8 }
  0xea   :  { %v103_v11 = vpop.f32.mrb[2].mxu0 }
  0xeb   :  { %v175_v12 = vpack.c.bf16 %v103_v11, %v100_v8  ;;  %141 = vadd.xlane.f32.xlu1 %v139_v10  ;;  %v196_v13 = vpop.f32.mrb[3].mxu0  ;;  %v140_v14 = vmul.f32 %v103_v11, %v103_v11 }
  0xed   :  { %176 = vst [vmem:[%s300_s2] sm:$0xff] %v175_v12   ;;  %130 = vadd.xlane.f32.xlu0 %v103_v11 }
  0xef   :  { %143 = vadd.xlane.f32.xlu1 %v140_v14 }
 0x176   :  { %v129_v16 = vpop.xlane.xlu0 %128 }
 0x177   :  { %v132_v18 = vadd.f32 %v129_v16, %v126_v15 }
 0x178   :  { %v142_v19 = vpop.xlane.xlu1 %141 }
 0x179   :  { %135 = vst.msk [vmem:[%s299_s3] sm:$0xff] %vm121_vm3, %v132_v18  ;;  %v145_v21 = vadd.f32 %v142_v19, %v137_v17 }
 0x17a   :  { %v131_v22 = vpop.xlane.xlu0 %130 }
 0x17b   :  { %147 = vst.msk [vmem:[%s301_s4] sm:$0xff] %vm121_vm3, %v145_v21  ;;  %v133_v24 = vadd.f32 %v131_v22, %v127_v20 }
 0x17c   :  { %v144_v25 = vpop.xlane.xlu1 %143 }
 0x17d   :  { %136 = vst.msk [vmem:[%s299_s3 + $0x8] sm:$0xff] %vm121_vm3, %v133_v24  ;;  %v146_v26 = vadd.f32 %v144_v25, %v138_v23 }
 0x17f   :  { %148 = vst.msk [vmem:[%s301_s4 + $0x8] sm:$0xff] %vm121_vm3, %v146_v26 }

// kernel: unet_innermost_block.2
= control target key start
LH: loop header
LB: loop body
LE: loop exit
PB: predicated region body
PF: predicated region fallthrough
CT: control target
= control target key end

     0   :  { %v124_v0 = vmov 0.0   ;;  %vm125_vm0 = vmmov 0   ;;  %vm45_vm1 = vcmask 523264   ;;  %s159_s1 = inlined_call_operand.vmem [shape: bf16[64,128], index: 1, kind: input, shape index: {}]   ;;  %s160_s0 = inlined_call_operand.vmem [shape: bf16[8,64], index: 0, kind: input, shape index: {}]   ;;  %s161_s2 = inlined_call_operand.vmem [shape: bf16[8,128], index: 2, kind: output, shape index: {}]  }
   0x1   :  { %106 = vmatprep.subr.bf16.mxu0 %v124_v0  ;;  %v120_v1 = vld [vmem:[%s159_s1] sm:$0xff]   ;;  %114 = vmatprep.mubr.msk.bf16.mxu0 %vm125_vm0, %v124_v0  ;;  %v121_v2 = vld [vmem:[%s159_s1 + $0x8] sm:$0xff]   ;;  %v122_v3 = vld [vmem:[%s159_s1 + $0x10] sm:$0xff]  }
   0x2   :  { %107 = vmatpush3.bf16.msra.mxu0 %v120_v1  ;;  %v123_v4 = vld [vmem:[%s159_s1 + $0x18] sm:$0xff]   ;;  %v12_v5 = vld [vmem:[%s160_s0] sm:$0xf] }
   0x3   :  { %108 = vmatprep.subr.bf16.mxu0 %v124_v0 }
   0x6   :  { %109 = vmatpush3.bf16.msra.mxu0 %v121_v2 }
   0x7   :  { %110 = vmatprep.subr.bf16.mxu0 %v124_v0 }
   0xa   :  { %111 = vmatpush3.bf16.msra.mxu0 %v122_v3 }
   0xb   :  { %112 = vmatprep.subr.bf16.mxu0 %v124_v0 }
   0xe   :  { %113 = vmatpush3.bf16.msra.mxu0 %v123_v4 }
  0x11   :  { %115 = vmatmul.mubr.msk.bf16.vlgmr.msra.gmra.mrb[0].mxu0 %vm45_vm1, %v12_v5 }
  0xe4   :  { %v83_v6 = vpop.f32.mrb[0].mxu0 }
  0xe5   :  { %v89_v7 = vmax.f32 %v83_v6, 0.0  ;;  %v116_v8 = vpop.f32.mrb[1].mxu0 }
  0xe6   :  { %v86_v9 = vpop.f32.mrb[2].mxu0 }
  0xe7   :  { %v90_v10 = vpack.c.bf16 %v89_v7, %v89_v7  ;;  %v117_v11 = vpop.f32.mrb[3].mxu0 }
  0xe9   :  { %91 = vst [vmem:[%s161_s2] sm:$0xf] %v90_v10 }

// kernel: squeeze.32
= control target key start
LH: loop header
LB: loop body
LE: loop exit
PB: predicated region body
PF: predicated region fallthrough
CT: control target
= control target key end

     0   :  { %v55_v8 = vmov 0.0   ;;  %s84_s0 = inlined_call_operand.vmem [shape: bf16[4,8], index: 0, kind: input, shape index: {}]   ;;  %s85_s1 = inlined_call_operand.vmem [shape: bf16[4,8,1], index: 1, kind: output, shape index: {}]  }
   0x1   :  { %v50_v0 = vld [vmem:[%s84_s0 + $0x1] ss:$0 sm:$0xff]  ;;  %v4_v1 = vld [vmem:[%s84_s0] ss:$0 sm:$0xff] }
   0x2   :  { %v27_v2 = vunpack.i.l.bf16 %v50_v0  ;;  %v5_v3 = vunpack.i.l.bf16 %v4_v1  ;;  %v41_v4 = vunpack.i.h.bf16 %v50_v0  ;;  %v17_v5 = vunpack.i.h.bf16 %v4_v1 }
   0x4   :  { %32 = vbcast.lane.b32.xlu1 %v27_v2, 256  ;;  %10 = vbcast.lane.b32.xlu0 %v5_v3, 256 }
   0x8   :  { %44 = vbcast.lane.b32.xlu1 %v41_v4, 256  ;;  %20 = vbcast.lane.b32.xlu0 %v17_v5, 256 }
  0x76   :  { %v33_v6 = vpop.permute.xlu1 %32  ;;  %v11_v7 = vpop.permute.xlu0 %10 }
  0x77   :  { %v35_v9 = vpack.c.bf16 %v55_v8, %v33_v6  ;;  %v12_v10 = vpack.c.bf16 %v55_v8, %v11_v7 }
  0x79   :  { %51 = vst [vmem:[%s85_s1 + $0x8] sm:$0xf] %v35_v9  ;;  %13 = vst [vmem:[%s85_s1] sm:$0xf] %v12_v10 }
  0x7a   :  { %v45_v11 = vpop.permute.xlu1 %44  ;;  %v21_v12 = vpop.permute.xlu0 %20 }
  0x7b   :  { %v47_v13 = vpack.c.bf16 %v55_v8, %v45_v11  ;;  %v23_v14 = vpack.c.bf16 %v55_v8, %v21_v12 }
  0x7d   :  { %53 = vst [vmem:[%s85_s1 + $0xc] sm:$0xf] %v47_v13  ;;  %49 = vst [vmem:[%s85_s1 + $0x4] sm:$0xf] %v23_v14 }

// kernel: unet_innermost_block.3
= control target key start
LH: loop header
LB: loop body
LE: loop exit
PB: predicated region body
PF: predicated region fallthrough
CT: control target
= control target key end

     0   :  { %v205_v0 = vmov 0.0   ;;  %vm206_vm0 = vmmov 0   ;;  %vm62_vm1 = vcmask 1043456   ;;  %vm58_vm2 = vcmask 588800   ;;  %s297_s1 = inlined_call_operand.vmem [shape: bf16[72,128], index: 1, kind: input, shape index: {}]   ;;  %s298_s0 = inlined_call_operand.vmem [shape: bf16[16,72], index: 0, kind: input, shape index: {}]   ;;  %s299_s3 = inlined_call_operand.vmem [shape: f32[16,1], index: 3, kind: output, shape index: {1}]   ;;  %s300_s2 = inlined_call_operand.vmem [shape: bf16[16,128], index: 2, kind: output, shape index: {0}]   ;;  %s301_s4 = inlined_call_operand.vmem [shape: f32[16,1], index: 4, kind: output, shape index: {2}]  }
   0x1   :  { %183 = vmatprep.subr.bf16.mxu0 %v205_v0  ;;  %v199_v1 = vld [vmem:[%s297_s1] sm:$0xff]   ;;  %193 = vmatprep.mubr.msk.bf16.mxu0 %vm206_vm0, %v205_v0  ;;  %v200_v2 = vld [vmem:[%s297_s1 + $0x8] sm:$0xff]   ;;  %v201_v3 = vld [vmem:[%s297_s1 + $0x10] sm:$0xff]   ;;  %vm121_vm3 = vcmask 7168  }
   0x2   :  { %184 = vmatpush3.bf16.msra.mxu0 %v199_v1  ;;  %v202_v4 = vld [vmem:[%s297_s1 + $0x18] sm:$0xff]   ;;  %v203_v5 = vld [vmem:[%s297_s1 + $0x20] ss:$0 sps:$4 sm:$0xff]   ;;  %122 = vst.msk [vmem:[%s299_s3] sm:$0xff] %vm121_vm3, %v205_v0  ;;  %123 = vst.msk [vmem:[%s299_s3 + $0x8] sm:$0xff] %vm121_vm3, %v205_v0 }
   0x3   :  { %185 = vmatprep.subr.bf16.mxu0 %v205_v0  ;;  %v64_v6 = vsel %vm62_vm1, %v203_v5, 0  ;;  %v204_v7 = vld [vmem:[%s298_s0] sm:$0xff]   ;;  %124 = vst.msk [vmem:[%s301_s4] sm:$0xff] %vm121_vm3, %v205_v0  ;;  %125 = vst.msk [vmem:[%s301_s4 + $0x8] sm:$0xff] %vm121_vm3, %v205_v0 }
   0x6   :  { %186 = vmatpush3.bf16.msra.mxu0 %v200_v2 }
   0x7   :  { %187 = vmatprep.subr.bf16.mxu0 %v205_v0 }
   0x9   :  { %v126_v15 = vld [vmem:[%s299_s3] sm:$0xff]  ;;  %v127_v20 = vld [vmem:[%s299_s3 + $0x8] sm:$0xff] }
   0xa   :  { %188 = vmatpush3.bf16.msra.mxu0 %v201_v3  ;;  %v137_v17 = vld [vmem:[%s301_s4] sm:$0xff]  ;;  %v138_v23 = vld [vmem:[%s301_s4 + $0x8] sm:$0xff] }
   0xb   :  { %189 = vmatprep.subr.bf16.mxu0 %v205_v0 }
   0xe   :  { %190 = vmatpush3.bf16.msra.mxu0 %v202_v4 }
   0xf   :  { %191 = vmatprep.subr.bf16.mxu0 %v205_v0 }
  0x12   :  { %192 = vmatpush3.bf16.msra.mxu0 %v64_v6 }
  0x15   :  { %194 = vmatmul.mubr.msk.bf16.vlgmr.msra.gmra.mrb[0].mxu0 %vm58_vm2, %v204_v7 }
  0xe8   :  { %v100_v8 = vpop.f32.mrb[0].mxu0 }
  0xe9   :  { %128 = vadd.xlane.f32.xlu0 %v100_v8  ;;  %v195_v9 = vpop.f32.mrb[1].mxu0  ;;  %v139_v10 = vmul.f32 %v100_v8, %v100_v8 }
  0xea   :  { %v103_v11 = vpop.f32.mrb[2].mxu0 }
  0xeb   :  { %v175_v12 = vpack.c.bf16 %v103_v11, %v100_v8  ;;  %141 = vadd.xlane.f32.xlu1 %v139_v10  ;;  %v196_v13 = vpop.f32.mrb[3].mxu0  ;;  %v140_v14 = vmul.f32 %v103_v11, %v103_v11 }
  0xed   :  { %176 = vst [vmem:[%s300_s2] sm:$0xff] %v175_v12   ;;  %130 = vadd.xlane.f32.xlu0 %v103_v11 }
  0xef   :  { %143 = vadd.xlane.f32.xlu1 %v140_v14 }
 0x176   :  { %v129_v16 = vpop.xlane.xlu0 %128 }
 0x177   :  { %v132_v18 = vadd.f32 %v129_v16, %v126_v15 }
 0x178   :  { %v142_v19 = vpop.xlane.xlu1 %141 }
 0x179   :  { %135 = vst.msk [vmem:[%s299_s3] sm:$0xff] %vm121_vm3, %v132_v18  ;;  %v145_v21 = vadd.f32 %v142_v19, %v137_v17 }
 0x17a   :  { %v131_v22 = vpop.xlane.xlu0 %130 }
 0x17b   :  { %147 = vst.msk [vmem:[%s301_s4] sm:$0xff] %vm121_vm3, %v145_v21  ;;  %v133_v24 = vadd.f32 %v131_v22, %v127_v20 }
 0x17c   :  { %v144_v25 = vpop.xlane.xlu1 %143 }
 0x17d   :  { %136 = vst.msk [vmem:[%s299_s3 + $0x8] sm:$0xff] %vm121_vm3, %v133_v24  ;;  %v146_v26 = vadd.f32 %v144_v25, %v138_v23 }
 0x17f   :  { %148 = vst.msk [vmem:[%s301_s4 + $0x8] sm:$0xff] %vm121_vm3, %v146_v26 }

</bundles_post_ra>
